<compile_context>
chip_gen: v7x
topology: tpu7x:2x2x1
jax: 0.10.0
libtpu: 0.0.40
codegen_flags: <defaults>
</compile_context>

<pallas_src>
import jax
import jax.numpy as jnp
from jax.experimental import pallas as pl
from jax.experimental.pallas import tpu as pltpu

NEG_SLOPE = 0.01  # nn.LeakyReLU default


def _leaky_relu(x):
    return jnp.where(x > 0, x, NEG_SLOPE * x)


def _round_up(a, b):
    return (a + b - 1) // b * b


def experts_kernel(x_ref, w1_ref, w2_ref, w3_ref, o_ref):
    # Refs (expert dim squeezed out by the BlockSpecs):
    #   x_ref: (TN, Dp)  w1_ref: (Dp, Hp)  w2_ref: (Hp, Hp)  w3_ref: (Hp, Dp)
    cdt = w1_ref.dtype
    h1 = _leaky_relu(
        jnp.dot(x_ref[...], w1_ref[...], preferred_element_type=jnp.float32)
    ).astype(cdt)
    h2 = _leaky_relu(
        jnp.dot(h1, w2_ref[...], preferred_element_type=jnp.float32)
    ).astype(cdt)
    out = jnp.dot(h2, w3_ref[...], preferred_element_type=jnp.float32)
    o_ref[...] = out.astype(o_ref.dtype)


def experts_forward(x, w1, w2, w3, *, tn=None, compute_dtype=jnp.bfloat16):
    E, N, D = x.shape
    H = w1.shape[-1]
    assert w1.shape == (E, D, H)
    assert w2.shape == (E, H, H)
    assert w3.shape == (E, H, D)

    out_dtype = x.dtype

    # Lane-dense layout: feature dims -> multiples of 128 lanes.
    Dp = _round_up(D, 128)
    Hp = _round_up(H, 128)
    # Token tile: multiple of 8 sublanes, capped at the MXU M edge (256).
    if tn is None:
        tn = min(256, _round_up(N, 8))
    Np = _round_up(N, tn)
    n_tiles = Np // tn

    cdt = compute_dtype
    xc = jnp.pad(x.astype(cdt), ((0, 0), (0, Np - N), (0, Dp - D)))
    w1c = jnp.pad(w1.astype(cdt), ((0, 0), (0, Dp - D), (0, Hp - H)))
    w2c = jnp.pad(w2.astype(cdt), ((0, 0), (0, Hp - H), (0, Hp - H)))
    w3c = jnp.pad(w3.astype(cdt), ((0, 0), (0, Hp - H), (0, Dp - D)))

    # VMEM budget: double-buffered inputs/outputs + live f32 intermediates.
    bpe = jnp.dtype(cdt).itemsize
    w_bytes = (Dp * Hp + Hp * Hp + Hp * Dp) * bpe
    x_tile_bytes = tn * Dp * bpe
    o_tile_bytes = tn * Dp * jnp.dtype(out_dtype).itemsize
    interm_bytes = 3 * tn * Hp * 4
    est = 2 * (w_bytes + x_tile_bytes + o_tile_bytes) + interm_bytes
    try:
        vmem_cap = int(getattr(pltpu.get_tpu_info(), "vmem_capacity_bytes", 64 << 20))
    except Exception:
        vmem_cap = 64 << 20  # v7x per-TC VMEM; conservative fallback
    vmem_limit = int(min(max(est + (4 << 20), 32 << 20), (vmem_cap * 3) // 4))
    # TODO(synk): for very large D (double-buffered w2 exceeding ~3/4 of VMEM, e.g.
    # D >= 1024 on v7x) add a K grid axis over H for the w2 contraction with an f32
    # VMEM accumulator + pl.when init/finalize instead of keeping the full (Hp, Hp)
    # w2 block resident.

    out = pl.pallas_call(
        experts_kernel,
        out_shape=jax.ShapeDtypeStruct((E, Np, Dp), out_dtype),
        grid_spec=pltpu.PrefetchScalarGridSpec(
            num_scalar_prefetch=0,
            # Token-tile axis innermost -> each expert's weights stay VMEM-resident
            # across all of its token tiles.
            grid=(E, n_tiles),
            in_specs=[
                pl.BlockSpec((None, tn, Dp), lambda e, n: (e, n, 0)),
                pl.BlockSpec((None, Dp, Hp), lambda e, n: (e, 0, 0)),
                pl.BlockSpec((None, Hp, Hp), lambda e, n: (e, 0, 0)),
                pl.BlockSpec((None, Hp, Dp), lambda e, n: (e, 0, 0)),
            ],
            out_specs=pl.BlockSpec((None, tn, Dp), lambda e, n: (e, n, 0)),
        ),
        compiler_params=pltpu.CompilerParams(
            dimension_semantics=("parallel", "parallel"),
            vmem_limit_bytes=vmem_limit,
        ),
    )(xc, w1c, w2c, w3c)

    return out[:, :N, :D]


def experts_reference(x, w1, w2, w3):
    h1 = _leaky_relu(jnp.einsum("end,edh->enh", x, w1))
    h2 = _leaky_relu(jnp.einsum("end,edh->enh", h1, w2))
    return jnp.einsum("end,edh->enh", h2, w3)


if __name__ == "__main__":
    # Small shapes consistent with the module: dim=32, num_experts=4, seq(N)=8.
    E, N, D = 4, 8, 32
    H = D * 4

    key = jax.random.PRNGKey(0)
    kx, k1, k2, k3 = jax.random.split(key, 4)

    x = jax.random.normal(kx, (E, N, D), dtype=jnp.float32)
    w1 = jax.random.normal(k1, (E, D, H), dtype=jnp.float32)
    w2 = jax.random.normal(k2, (E, H, H), dtype=jnp.float32)
    w3 = jax.random.normal(k3, (E, H, D), dtype=jnp.float32)

    out = experts_forward(x, w1, w2, w3)
    out = jax.block_until_ready(out)
    assert out.shape == (E, N, D)

    # bf16 operands (f32 MXU accumulation) => compare with a scale-normalized max error.
    ref = experts_reference(x, w1, w2, w3)
    scale = jnp.max(jnp.abs(ref))
    max_err = float(jnp.max(jnp.abs(out.astype(jnp.float32) - ref)) / (scale + 1e-6))
    assert max_err < 5e-2, f"mismatch vs reference: normalized max err = {max_err}"

    print("KERNEL_OK")
</pallas_src>

<mosaic_0001>
module attributes {stable_mosaic.version = 11 : i64} {
  func.func @experts_kernel(%arg0: i32, %arg1: i32, %arg2: memref<1x8x128xbf16, #tpu.memory_space<vmem>>, %arg3: memref<1x128x128xbf16, #tpu.memory_space<vmem>>, %arg4: memref<1x128x128xbf16, #tpu.memory_space<vmem>>, %arg5: memref<1x128x128xbf16, #tpu.memory_space<vmem>>, %arg6: memref<1x8x128xf32, #tpu.memory_space<vmem>>) attributes {dimension_semantics = [#tpu.dimension_semantics<parallel>, #tpu.dimension_semantics<parallel>], iteration_bounds = array<i64: 4, 1>, scalar_prefetch = 0 : i64, scratch_operands = 0 : i64, tpu.core_type = #tpu.core_type<tc>, window_params = [{transform_indices = @transform_0, window_bounds = array<i64: 1, 8, 128>}, {transform_indices = @transform_1, window_bounds = array<i64: 1, 128, 128>}, {transform_indices = @transform_2, window_bounds = array<i64: 1, 128, 128>}, {transform_indices = @transform_3, window_bounds = array<i64: 1, 128, 128>}, {transform_indices = @transform_4, window_bounds = array<i64: 1, 8, 128>}]} {
    %c0 = arith.constant 0 : index
    %c0_0 = arith.constant 0 : index
    %c0_1 = arith.constant 0 : index
    %0 = vector.load %arg2[%c0, %c0_0, %c0_1] : memref<1x8x128xbf16, #tpu.memory_space<vmem>>, vector<1x8x128xbf16>
    %1 = vector.shape_cast %0 : vector<1x8x128xbf16> to vector<8x128xbf16>
    %c0_2 = arith.constant 0 : index
    %c0_3 = arith.constant 0 : index
    %c0_4 = arith.constant 0 : index
    %2 = vector.load %arg3[%c0_2, %c0_3, %c0_4] : memref<1x128x128xbf16, #tpu.memory_space<vmem>>, vector<1x128x128xbf16>
    %3 = vector.shape_cast %2 : vector<1x128x128xbf16> to vector<128x128xbf16>
    %cst = arith.constant dense<0.000000e+00> : vector<8x128xf32>
    %4 = tpu.matmul %1, %3, %cst {dimension_numbers = #tpu.dot_dimension_numbers<[1], [0], [0], [1], [0, 0, 1, 1], [], []>} : vector<8x128xbf16>, vector<128x128xbf16>, vector<8x128xf32> -> vector<8x128xf32>
    %cst_5 = arith.constant 0.000000e+00 : f32
    %5 = vector.broadcast %cst_5 : f32 to vector<8x128xf32>
    %6 = arith.cmpf ogt, %4, %5 : vector<8x128xf32>
    %cst_6 = arith.constant 0.00999999977 : f32
    %7 = vector.broadcast %cst_6 : f32 to vector<8x128xf32>
    %8 = arith.mulf %7, %4 : vector<8x128xf32>
    %9 = arith.select %6, %4, %8 : vector<8x128xi1>, vector<8x128xf32>
    %10 = arith.truncf %9 : vector<8x128xf32> to vector<8x128xbf16>
    %c0_7 = arith.constant 0 : index
    %c0_8 = arith.constant 0 : index
    %c0_9 = arith.constant 0 : index
    %11 = vector.load %arg4[%c0_7, %c0_8, %c0_9] : memref<1x128x128xbf16, #tpu.memory_space<vmem>>, vector<1x128x128xbf16>
    %12 = vector.shape_cast %11 : vector<1x128x128xbf16> to vector<128x128xbf16>
    %cst_10 = arith.constant dense<0.000000e+00> : vector<8x128xf32>
    %13 = tpu.matmul %10, %12, %cst_10 {dimension_numbers = #tpu.dot_dimension_numbers<[1], [0], [0], [1], [0, 0, 1, 1], [], []>} : vector<8x128xbf16>, vector<128x128xbf16>, vector<8x128xf32> -> vector<8x128xf32>
    %cst_11 = arith.constant 0.000000e+00 : f32
    %14 = vector.broadcast %cst_11 : f32 to vector<8x128xf32>
    %15 = arith.cmpf ogt, %13, %14 : vector<8x128xf32>
    %cst_12 = arith.constant 0.00999999977 : f32
    %16 = vector.broadcast %cst_12 : f32 to vector<8x128xf32>
    %17 = arith.mulf %16, %13 : vector<8x128xf32>
    %18 = arith.select %15, %13, %17 : vector<8x128xi1>, vector<8x128xf32>
    %19 = arith.truncf %18 : vector<8x128xf32> to vector<8x128xbf16>
    %c0_13 = arith.constant 0 : index
    %c0_14 = arith.constant 0 : index
    %c0_15 = arith.constant 0 : index
    %20 = vector.load %arg5[%c0_13, %c0_14, %c0_15] : memref<1x128x128xbf16, #tpu.memory_space<vmem>>, vector<1x128x128xbf16>
    %21 = vector.shape_cast %20 : vector<1x128x128xbf16> to vector<128x128xbf16>
    %cst_16 = arith.constant dense<0.000000e+00> : vector<8x128xf32>
    %22 = tpu.matmul %19, %21, %cst_16 {dimension_numbers = #tpu.dot_dimension_numbers<[1], [0], [0], [1], [0, 0, 1, 1], [], []>} : vector<8x128xbf16>, vector<128x128xbf16>, vector<8x128xf32> -> vector<8x128xf32>
    %c0_17 = arith.constant 0 : index
    %c0_18 = arith.constant 0 : index
    %c0_19 = arith.constant 0 : index
    %23 = vector.load %arg6[%c0_17, %c0_18, %c0_19] : memref<1x8x128xf32, #tpu.memory_space<vmem>>, vector<1x8x128xf32>
    %24 = vector.shape_cast %23 : vector<1x8x128xf32> to vector<8x128xf32>
    %25 = vector.shape_cast %22 : vector<8x128xf32> to vector<1x8x128xf32>
    tpu.vector_store %arg6[%c0_17, %c0_18, %c0_19], %25 {strides = array<i32>} : memref<1x8x128xf32, #tpu.memory_space<vmem>>, vector<1x8x128xf32>,
    return
  }
  func.func @transform_0(%arg0: i32, %arg1: i32) -> (i32, i32, i32) {
    %c0_i32 = arith.constant 0 : i32
    %c0_i32_0 = arith.constant 0 : i32
    return %arg0, %arg1, %c0_i32 : i32, i32, i32
  }
  func.func @transform_1(%arg0: i32, %arg1: i32) -> (i32, i32, i32) {
    %c0_i32 = arith.constant 0 : i32
    %c0_i32_0 = arith.constant 0 : i32
    %c0_i32_1 = arith.constant 0 : i32
    return %arg0, %c0_i32, %c0_i32_0 : i32, i32, i32
  }
  func.func @transform_2(%arg0: i32, %arg1: i32) -> (i32, i32, i32) {
    %c0_i32 = arith.constant 0 : i32
    %c0_i32_0 = arith.constant 0 : i32
    %c0_i32_1 = arith.constant 0 : i32
    return %arg0, %c0_i32, %c0_i32_0 : i32, i32, i32
  }
  func.func @transform_3(%arg0: i32, %arg1: i32) -> (i32, i32, i32) {
    %c0_i32 = arith.constant 0 : i32
    %c0_i32_0 = arith.constant 0 : i32
    %c0_i32_1 = arith.constant 0 : i32
    return %arg0, %c0_i32, %c0_i32_0 : i32, i32, i32
  }
  func.func @transform_4(%arg0: i32, %arg1: i32) -> (i32, i32, i32) {
    %c0_i32 = arith.constant 0 : i32
    %c0_i32_0 = arith.constant 0 : i32
    return %arg0, %arg1, %c0_i32 : i32, i32, i32
  }
}

</mosaic_0001>

<bundles_post_ra>
// kernel: tpu_custom_call.1
= control target key start
LH: loop header
LB: loop body
LE: loop exit
PB: predicated region body
PF: predicated region fallthrough
CT: control target
= control target key end

     0   :  { %s1691_s0 = inlined_call_operand.hbm [shape: bf16[4,8,128], index: 0, kind: input, shape index: {}]   ;;  %s1692_s1 = inlined_call_operand.hbm [shape: bf16[4,128,128], index: 1, kind: input, shape index: {}]   ;;  %s1693_s2 = inlined_call_operand.hbm [shape: bf16[4,128,128], index: 2, kind: input, shape index: {}]   ;;  %s1694_s3 = inlined_call_operand.hbm [shape: bf16[4,128,128], index: 3, kind: input, shape index: {}]   ;;  %s1695_s4 = inlined_call_operand.hbm [shape: f32[4,8,128], index: 4, kind: output, shape index: {}]  }
   0x1   :  { %1706 = sst [smem:[#allocation20_spill]] %s1692_s1 }
   0x2   :  { %9 = vsyncpa [#allocation3], 0 }
   0x3   :  { %11 = vsyncpa [#allocation3 + $0x1], 0 }
   0x4   :  { %12 = vsyncpa [#allocation6], 0 }
   0x5   :  { %14 = vsyncpa [#allocation6 + $0x1], 0 }
   0x6   :  { %15 = vsyncpa [#allocation9], 0 }
   0x7   :  { %17 = vsyncpa [#allocation9 + $0x1], 0 }
   0x8   :  { %18 = vsyncpa [#allocation4], 0 }
   0x9   :  { %20 = vsyncpa [#allocation4 + $0x1], 0  ;;  %s1321_s15 = smov 0   ;;  %s1323_s16 = smov 0  }
   0xa   :  { %s1325_s17 = smov 0   ;;  %s1327_s18 = smov 0  }
   0xb   :  { %s1329_s19 = smov 0   ;;  %s1331_s20 = smov 0  }
   0xc LB: > { %1707 = sst [smem:[#allocation15_spill]] %s1273_s17  ;;  %s1352_s21 = sadd.s32 4294967295, %s1285_s20   ;;  %s1285_s20 = sphi %s1331_s20, %s26_s20   ;;  %s1281_s19 = sphi %s1329_s19, %s1730_s19   ;;  %s1277_s18 = sphi %s1327_s18, %s1729_s18   ;;  %s1273_s17 = sphi %s1325_s17, %s1728_s17   ;;  %s1269_s16 = sphi %s1323_s16, %s1732_s16   ;;  %s1265_s15 = sphi %s1321_s15, %s1731_s15  }
   0xd   : > { %1708 = sst [smem:[#allocation16_spill]] %s1281_s19  ;;  %s832_s22 = sadd.s32 4294967294, %s1285_s20  }
   0xe   : > { %s38_s23 = sadd.s32 1, %s1281_s19  ;;  %s47_s24 = sadd.s32 1, %s1273_s17 }
   0xf   : > { %p40_p0 = scmp.ge.s32.totalorder %s38_s23, 4  ;;  %p54_p1 = scmp.ne.s32.totalorder %s1273_s17, %s1269_s16 }
  0x10   : > { %p55_p2 = scmp.eq.s32.totalorder %s1285_s20, 0  ;;  %p60_p3 = scmp.ne.s32.totalorder %s1269_s16, %s1265_s15 }
  0x11   : > { %s1734_s23 = smov (%p40_p0, %s38_s23), 0  ;;  %p61_p5 = scmp.eq.s32.totalorder %s1352_s21, 0 }
  0x12   : > { %1709 = sst [smem:[#allocation17_spill]] %s1734_s23  ;;  %p1364_p4 = por %p55_p2, %p54_p1 }
  0x13   : > { %s42_s26 = ssub.s32 %s1281_s19, %s1734_s23  ;;  %p164_p6 = scmp.eq.s32.totalorder %s1352_s21, 3 }
  0x14   : > { %p45_p7 = scmp.eq.s32.totalorder %s42_s26, 0  ;;  %p1372_p8 = por %p61_p5, %p60_p3 }
  0x15   : > { %p1376_p9 = por %p164_p6, %p54_p1  ;;  %p170_p10 = scmp.eq.s32.totalorder %s832_s22, 3 }
  0x16   : > { %s1711_s27 = scalar_select %p1372_p8, 1, 0 }
  0x17   : > { %s1712_s28 = scalar_select %p1376_p9, 1, 0 }
  0x18   : > { %s1381_s29 = scalar_select %p45_p7, %s1273_s17, %s47_s24  }
  0x19   : > { %p1383_p11 = por %p170_p10, %p60_p3  ;;  %p997_p12 = scmp.lt.s32.totalorder %s1285_s20, 4 }
  0x1a   : > { %1713 = sst [smem:[#allocation18_spill]] %s1381_s29  ;;  %s1389_s5 = sand.u32 1, %s1273_s17  }
  0x1b   : > { %s1714_s30 = scalar_select %p1383_p11, 1, 0 }
  0x1c   : > { %s209_s6 = sand.u32 1, %s1285_s20   ;;  %s1393_s7 = sshll.u32 %s1389_s5, 6 }
  0x1d   : > { %1715 = sst [smem:[#allocation19_spill]] %s1714_s30  ;;  %p1397_p13 = pnand %p997_p12, %p1364_p4 }
  0x1e   : > { %s1402_s9 = sshll.u32 %s1281_s19, 10  ;;  %s1717_s1 = sld [smem:[#allocation20_spill]] }
  0x1f   : > { %s213_s13 = scalar_lea.vmem [#allocation5], %s1393_s7  ;;  %s1413_s22 = scalar_lea.sflag [#allocation6], %s209_s6 }
  0x20   : > { %s220_s14 = sshll.u32 %s213_s13, 4  ;;  %p1419_p1 = pneg %p1397_p13  ;;  %s1411_s14 = int_to_ptr.vmem [resolvable:$true] %s220_s14 }
  0x24   : > { %s1408_s12 = scalar_lea.hbm %s1717_s1, %s1402_s9  ;;  %s1080_s11 = scalar_lea.hbm %s1717_s1, 4096 }
  0x25   : > { %s1075_s24 = scalar_lea.hbm %s1408_s12, 1024  ;;  %p1081_p4 = scmp.lt.u32.totalorder %s1408_s12, %s1717_s1 }
  0x26   : > { %p1076_p0 = scmp.ne.s32.totalorder %s1408_s12, %s1075_s24  ;;  %p1082_p5 = scmp.lt.u32.totalorder %s1080_s11, %s1075_s24 }
  0x27   : > { %p1084_p7 = scmp.lt.u32.totalorder %s1075_s24, %s1408_s12 }
  0x28   : > { %p1078_p2 = pnand %p1419_p1, %p1076_p0  ;;  %p1083_p6 = por %p1082_p5, %p1081_p4 }
  0x2a   : > { %p1079_p3 = pneg %p1078_p2  ;;  %p1085_p10 = por %p1084_p7, %p1083_p6 }
  0x2c   : > { %p1086_p12 = pnand %p1085_p10, %p1079_p3 }
  0x2e   : > { %1089 = shalt.err (!%p1086_p12)
}
  0x2f   : > { %s1090_s6 = scalar_lea.vmem %s1411_s14, 1024  ;;  %s1287_s26 = smov [#allocation5]  }
  0x30   : > { %p1091_p0 = scmp.ne.s32.totalorder %s1411_s14, %s1090_s6  ;;  %s1095_s10 = sshll.u32 %s1287_s26, 4  ;;  %s1096_s10 = int_to_ptr.vmem [resolvable:$false] %s1095_s10 }
  0x31   : > { %s1097_s23 = scalar_lea.vmem %s1096_s10, 2048  ;;  %p1098_p9 = scmp.lt.s32.totalorder %s1411_s14, %s1096_s10 }
  0x32   : > { %p1093_p2 = pnand %p1091_p0, %p1419_p1  ;;  %p1099_p8 = scmp.lt.s32.totalorder %s1097_s23, %s1090_s6 }
  0x34   : > { %p1094_p11 = pneg %p1093_p2  ;;  %p1100_p4 = por %p1099_p8, %p1098_p9 }
  0x36   : > { %p1101_p5 = pnand %p1100_p4, %p1094_p11 }
  0x38   : > { %1104 = shalt.err (!%p1101_p5)
}
  0x39   : > { %s1700_s24 = smov 64   ;;  %s1702_s11 = smov 4  }
  0x3a   : > { %986 = dma.hbm_to_vmem [thread:$0]  (!%p1397_p13), %s1408_s12, 1024, %s1411_s14, %s1413_s22, %s1700_s24, %s1700_s24, %s1702_s11  }
  0x3b   : > { %p846_p8 = scmp.ge.s32.totalorder %s1285_s20, 1  ;;  %p270_p9 = scmp.lt.s32.totalorder %s1285_s20, 5 }
  0x3c   : > { %s835_s6 = sshll.u32 %s1389_s5, 2  ;;  %s836_s26 = sshll.u32 %s1281_s19, 6 }
  0x3d   : > { %p1448_p11 = pnand %p846_p8, %p270_p9  ;;  %s1457_s1 = scalar_lea.hbm %s1691_s0, %s836_s26 }
  0x3e   : > { %s194_s29 = scalar_lea.vmem [#allocation2], %s835_s6  ;;  %s1465_s24 = scalar_lea.hbm %s1693_s2, %s1402_s9 }
  0x3f   : > { %s1719_s13 = scalar_select %p1448_p11, 1, 0 }
  0x40   : > { %s202_s17 = sshll.u32 %s194_s29, 4  ;;  %s191_s11 = scalar_lea.sflag [#allocation3], %s1389_s5  ;;  %s1459_s17 = int_to_ptr.vmem [resolvable:$true] %s202_s17 }
  0x41   : > { %s1105_s19 = scalar_lea.hbm %s1457_s1, 64  ;;  %s1110_s23 = scalar_lea.hbm %s1691_s0, 256 }
  0x42   : > { %p1106_p3 = scmp.ne.s32.totalorder %s1457_s1, %s1105_s19  ;;  %p1111_p10 = scmp.lt.u32.totalorder %s1457_s1, %s1691_s0 }
  0x43   : > { %p1112_p12 = scmp.lt.u32.totalorder %s1110_s23, %s1105_s19  ;;  %p1114_p2 = scmp.lt.u32.totalorder %s1105_s19, %s1457_s1 }
  0x44   : > { %p1108_p6 = pnand %p1106_p3, %p1419_p1 }
  0x45   : > { %p1113_p0 = por %p1112_p12, %p1111_p10 }
  0x46   : > { %p1109_p7 = pneg %p1108_p6 }
  0x47   : > { %p1115_p4 = por %p1114_p2, %p1113_p0 }
  0x49   : > { %p1116_p5 = pnand %p1115_p4, %p1109_p7 }
  0x4b   : > { %1119 = shalt.err (!%p1116_p5)
}
  0x4c   : > { %s1120_s29 = scalar_lea.vmem %s1459_s17, 64  ;;  %s1290_s12 = smov [#allocation2]  }
  0x4d   : > { %p1121_p8 = scmp.ne.s32.totalorder %s1459_s17, %s1120_s29  ;;  %s1125_s14 = sshll.u32 %s1290_s12, 4  ;;  %s1126_s14 = int_to_ptr.vmem [resolvable:$false] %s1125_s14 }
  0x4e   : > { %s1127_s30 = scalar_lea.vmem %s1126_s14, 128  ;;  %p1128_p6 = scmp.lt.s32.totalorder %s1459_s17, %s1126_s14 }
  0x4f   : > { %p1123_p9 = pnand %p1121_p8, %p1419_p1  ;;  %p1129_p11 = scmp.lt.s32.totalorder %s1127_s30, %s1120_s29 }
  0x51   : > { %p1124_p3 = pneg %p1123_p9  ;;  %p1130_p10 = por %p1129_p11, %p1128_p6 }
  0x53   : > { %p1131_p12 = pnand %p1130_p10, %p1124_p3 }
  0x55   : > { %1134 = shalt.err (!%p1131_p12)
}
  0x56   : > { %983 = dma.hbm_to_vmem [thread:$0]  (!%p1397_p13), %s1457_s1, 64, %s1459_s17, %s191_s11  }
  0x57   : > { %s234_s19 = scalar_lea.vmem [#allocation7], %s1393_s7  ;;  %s1135_s10 = scalar_lea.hbm %s1465_s24, 1024 }
  0x58   : > { %s241_s26 = sshll.u32 %s234_s19, 4  ;;  %p1136_p7 = scmp.ne.s32.totalorder %s1465_s24, %s1135_s10  ;;  %s1490_s26 = int_to_ptr.vmem [resolvable:$true] %s241_s26 }
  0x59   : > { %s1140_s29 = scalar_lea.hbm %s1693_s2, 4096  ;;  %p1141_p2 = scmp.lt.u32.totalorder %s1465_s24, %s1693_s2 }
  0x5a   : > { %p1138_p11 = pnand %p1136_p7, %p1419_p1  ;;  %p1142_p4 = scmp.lt.u32.totalorder %s1140_s29, %s1135_s10 }
  0x5b   : > { %p1144_p8 = scmp.lt.u32.totalorder %s1135_s10, %s1465_s24 }
  0x5c   : > { %p1139_p0 = pneg %p1138_p11  ;;  %p1143_p5 = por %p1142_p4, %p1141_p2 }
  0x5e   : > { %p1145_p9 = por %p1144_p8, %p1143_p5 }
  0x60   : > { %p1146_p3 = pnand %p1145_p9, %p1139_p0 }
  0x62   : > { %1149 = shalt.err (!%p1146_p3)
}
  0x63   : > { %s1150_s1 = scalar_lea.vmem %s1490_s26, 1024  ;;  %s1291_s17 = smov [#allocation7]  }
  0x64   : > { %p1151_p6 = scmp.ne.s32.totalorder %s1490_s26, %s1150_s1  ;;  %s1155_s11 = sshll.u32 %s1291_s17, 4  ;;  %s1156_s11 = int_to_ptr.vmem [resolvable:$false] %s1155_s11 }
  0x65   : > { %s1157_s30 = scalar_lea.vmem %s1156_s11, 2048  ;;  %p1158_p7 = scmp.lt.s32.totalorder %s1490_s26, %s1156_s11 }
  0x66   : > { %p1153_p10 = pnand %p1151_p6, %p1419_p1  ;;  %p1159_p11 = scmp.lt.s32.totalorder %s1157_s30, %s1150_s1 }
  0x68   : > { %p1154_p12 = pneg %p1153_p10  ;;  %p1160_p2 = por %p1159_p11, %p1158_p7 }
  0x6a   : > { %p1161_p4 = pnand %p1160_p2, %p1154_p12 }
  0x6c   : > { %1164 = shalt.err (!%p1161_p4)
}
  0x6d   : > { %s1720_s19 = smov 4   ;;  %s1721_s10 = smov 64  }
  0x6e   : > { %989 = dma.hbm_to_vmem [thread:$0]  (!%p1397_p13), %s1465_s24, 1024, %s1490_s26, %s1413_s22, %s1721_s10, %s1721_s10, %s1720_s19  }
  0x6f   : > { %s1521_s29 = scalar_lea.hbm %s1694_s3, %s1402_s9  ;;  %s255_s12 = scalar_lea.vmem [#allocation8], %s1393_s7 }
  0x70   : > { %s262_s14 = sshll.u32 %s255_s12, 4  ;;  %s252_s1 = scalar_lea.sflag [#allocation9], %s1389_s5  ;;  %s1524_s14 = int_to_ptr.vmem [resolvable:$true] %s262_s14 }
  0x71   : > { %s1165_s17 = scalar_lea.hbm %s1521_s29, 1024  ;;  %s1170_s26 = scalar_lea.hbm %s1694_s3, 4096 }
  0x72   : > { %p1166_p0 = scmp.ne.s32.totalorder %s1521_s29, %s1165_s17  ;;  %p1171_p9 = scmp.lt.u32.totalorder %s1521_s29, %s1694_s3 }
  0x73   : > { %p1172_p3 = scmp.lt.u32.totalorder %s1170_s26, %s1165_s17  ;;  %p1174_p10 = scmp.lt.u32.totalorder %s1165_s17, %s1521_s29 }
  0x74   : > { %p1168_p5 = pnand %p1166_p0, %p1419_p1 }
  0x75   : > { %p1173_p6 = por %p1172_p3, %p1171_p9 }
  0x76   : > { %p1169_p8 = pneg %p1168_p5 }
  0x77   : > { %p1175_p12 = por %p1174_p10, %p1173_p6 }
  0x79   : > { %p1176_p7 = pnand %p1175_p12, %p1169_p8 }
  0x7b   : > { %1179 = shalt.err (!%p1176_p7)
}
  0x7c   : > { %s1180_s7 = scalar_lea.vmem %s1524_s14, 1024  ;;  %s1292_s30 = smov [#allocation8]  }
  0x7d   : > { %p1181_p11 = scmp.ne.s32.totalorder %s1524_s14, %s1180_s7  ;;  %s1185_s23 = sshll.u32 %s1292_s30, 4  ;;  %s1186_s23 = int_to_ptr.vmem [resolvable:$false] %s1185_s23 }
  0x7e   : > { %s1187_s6 = scalar_lea.vmem %s1186_s23, 2048  ;;  %p1188_p0 = scmp.lt.s32.totalorder %s1524_s14, %s1186_s23 }
  0x7f   : > { %p1183_p2 = pnand %p1181_p11, %p1419_p1  ;;  %p1189_p5 = scmp.lt.s32.totalorder %s1187_s6, %s1180_s7 }
  0x81   : > { %p1184_p4 = pneg %p1183_p2  ;;  %p1190_p9 = por %p1189_p5, %p1188_p0 }
  0x83   : > { %p1191_p3 = pnand %p1190_p9, %p1184_p4 }
  0x85   : > { %1194 = shalt.err (!%p1191_p3)
}
  0x86   : > { %992 = dma.hbm_to_vmem [thread:$0]  (!%p1397_p13), %s1521_s29, 1024, %s1524_s14, %s252_s1, %s1721_s10, %s1721_s10, %s1720_s19  }
  0x87   : > { %p1722_p1 = scmp.ne.s32.totalorder %s1719_s13, 0 }
  0x88   : > { %s1556_s25 = sand.u32 (!%p1722_p1), 1, %s1269_s16   ;;  %p1723_p8 = scmp.ne.s32.totalorder (!%p1722_p1), %s1711_s27, 0 }
  0x89   : > { %274 = sbr.rel (%p1722_p1) target bundleno = 846 (0x34e), region = 36  ;;  %s847_s12 = sshll.u32 (!%p1722_p1), %s1556_s25, 2 }
  0x8a   : > { %s277_s17 = scalar_lea.sflag (!%p1722_p1), [#allocation3], %s1556_s25  ;;  %s1560_s8 = scalar_lea.vmem (!%p1722_p1), [#allocation2], %s847_s12 }
  0x90   : > { %1248 = dma.done.wait (%p1723_p8), %s277_s17, 64  }
  0x91   : > { %1250 = vsyncadd (%p1723_p8), %s277_s17, 4294967232  ;;  %s285_s5 = sand.u32 1, %s1352_s21   ;;  %s848_s13 = sshll.u32 %s1556_s25, 6 }
  0x92   : > { %s286_s19 = scalar_lea.sflag [#allocation6], %s285_s5  ;;  %s1568_s10 = scalar_lea.vmem [#allocation5], %s848_s13 }
  0x93   : > { %1252 = dma.done.wait (%p1723_p8), %s286_s19, 2048  }
  0x94   : > { %1254 = vsyncadd (%p1723_p8), %s286_s19, 4294965248  ;;  %s1574_s29 = scalar_lea.vmem [#allocation7], %s848_s13  ;;  %s304_s14 = scalar_lea.sflag [#allocation9], %s1556_s25 }
  0x95   : > { %s1577_s1 = scalar_lea.vmem [#allocation8], %s848_s13 }
  0x96   : > { %1256 = dma.done.wait (%p1723_p8), %s304_s14, 1024  }
  0x97   : > { %1258 = vsyncadd (%p1723_p8), %s304_s14, 4294966272  ;;  %v1293_v0 = vmov 0.0   ;;  %vm1294_vm0 = vmmov 0   ;;  %v1051_v1 = vld [vmem:[%s1568_s10] sm:$0xff]   ;;  %v1052_v2 = vld [vmem:[%s1568_s10 + $0x8] sm:$0xff]   ;;  %s851_s21 = sshll.u32 %s1556_s25, 3 }
  0x98   : > { %910 = vmatprep.subr.bf16.mxu0 %v1293_v0  ;;  %926 = vmatprep.mubr.msk.bf16.mxu0 %vm1294_vm0, %v1293_v0  ;;  %v1053_v3 = vld [vmem:[%s1568_s10 + $0x10] sm:$0xff]   ;;  %v1059_v4 = vld [vmem:[%s1574_s29] sm:$0xff]   ;;  %v1054_v5 = vld [vmem:[%s1568_s10 + $0x18] sm:$0xff]   ;;  %s346_s27 = scalar_lea.vmem [#allocation10], %s851_s21  ;;  %s877_s24 = sshll.u32 %s1277_s18, 7 }
  0x99   : > { %930 = vmatprep.subr.bf16.mxu1 %v1293_v0  ;;  %946 = vmatprep.mubr.msk.bf16.mxu1 %vm1294_vm0, %v1293_v0  ;;  %v1060_v6 = vld [vmem:[%s1574_s29 + $0x8] sm:$0xff]   ;;  %v1055_v7 = vld [vmem:[%s1568_s10 + $0x20] sm:$0xff]   ;;  %v1061_v8 = vld [vmem:[%s1574_s29 + $0x10] sm:$0xff]   ;;  %s685_s22 = sshll.u32 %s346_s27, 4  ;;  %s1645_s11 = scalar_lea.hbm %s1695_s4, %s877_s24  ;;  %s1640_s22 = int_to_ptr.vmem [resolvable:$true] %s685_s22 }
  0x9a   : > { %911 = vmatpush3.bf16.msra.mxu0 %v1051_v1  ;;  %931 = vmatpush3.bf16.msra.mxu1 %v1059_v4  ;;  %v1056_v9 = vld [vmem:[%s1568_s10 + $0x28] sm:$0xff]   ;;  %v1062_v10 = vld [vmem:[%s1574_s29 + $0x18] sm:$0xff]   ;;  %v1057_v11 = vld [vmem:[%s1568_s10 + $0x30] sm:$0xff]   ;;  %s671_s7 = scalar_lea.sflag [#allocation4], %s1556_s25  ;;  %s1195_s30 = scalar_lea.vmem %s1640_s22, 128 }
  0x9b   : > { %912 = vmatprep.subr.bf16.mxu0 %v1293_v0  ;;  %932 = vmatprep.subr.bf16.mxu1 %v1293_v0  ;;  %v1063_v12 = vld [vmem:[%s1574_s29 + $0x20] sm:$0xff]   ;;  %v1058_v13 = vld [vmem:[%s1568_s10 + $0x38] sm:$0xff]   ;;  %v1064_v14 = vld [vmem:[%s1574_s29 + $0x28] sm:$0xff]   ;;  %p1196_p13 = scmp.ne.s32.totalorder %s1640_s22, %s1195_s30  ;;  %p1724_p6 = scmp.ne.s32.totalorder %s1712_s28, 0 }
  0x9c   : > { %v348_v15 = vld [vmem:[%s1560_s8] sm:$0xf]  ;;  %v1065_v16 = vld [vmem:[%s1574_s29 + $0x30] sm:$0xff]   ;;  %v1067_v18 = vld [vmem:[%s1577_s1] sm:$0xff]   ;;  %s1295_s18 = smov [#allocation10]  }
  0x9d   : > { %v1066_v17 = vld [vmem:[%s1574_s29 + $0x38] sm:$0xff]   ;;  %v1068_v19 = vld [vmem:[%s1577_s1 + $0x8] sm:$0xff]   ;;  %v1069_v20 = vld [vmem:[%s1577_s1 + $0x10] sm:$0xff]   ;;  %p1197_p10 = pnand %p1196_p13, %p1724_p6  ;;  %s1199_s23 = sshll.u32 %s1295_s18, 4  ;;  %s1200_s23 = int_to_ptr.vmem [resolvable:$false] %s1199_s23 }
  0x9e   : > { %913 = vmatpush3.bf16.msra.mxu0 %v1052_v2  ;;  %933 = vmatpush3.bf16.msra.mxu1 %v1060_v6  ;;  %v1070_v21 = vld [vmem:[%s1577_s1 + $0x18] sm:$0xff]   ;;  %v1071_v22 = vld [vmem:[%s1577_s1 + $0x20] sm:$0xff]   ;;  %v1072_v23 = vld [vmem:[%s1577_s1 + $0x28] sm:$0xff]   ;;  %s1201_s6 = scalar_lea.vmem %s1200_s23, 256  ;;  %p1202_p7 = scmp.lt.s32.totalorder %s1640_s22, %s1200_s23 }
  0x9f   : > { %914 = vmatprep.subr.bf16.mxu0 %v1293_v0  ;;  %934 = vmatprep.subr.bf16.mxu1 %v1293_v0  ;;  %v1073_v24 = vld [vmem:[%s1577_s1 + $0x30] sm:$0xff]   ;;  %v1074_v32 = vld [vmem:[%s1577_s1 + $0x38] sm:$0xff]   ;;  %p1198_p12 = pneg %p1197_p10  ;;  %p1203_p11 = scmp.lt.s32.totalorder %s1201_s6, %s1195_s30 }
  0xa1   : > { %p1204_p2 = por %p1203_p11, %p1202_p7 }
  0xa2   : > { %915 = vmatpush3.bf16.msra.mxu0 %v1053_v3  ;;  %935 = vmatpush3.bf16.msra.mxu1 %v1061_v8 }
  0xa3   : > { %916 = vmatprep.subr.bf16.mxu0 %v1293_v0  ;;  %936 = vmatprep.subr.bf16.mxu1 %v1293_v0  ;;  %p1205_p4 = pnand %p1204_p2, %p1198_p12 }
  0xa6   : > { %917 = vmatpush3.bf16.msra.mxu0 %v1054_v5  ;;  %937 = vmatpush3.bf16.msra.mxu1 %v1062_v10 }
  0xa7   : > { %918 = vmatprep.subr.bf16.mxu0 %v1293_v0  ;;  %938 = vmatprep.subr.bf16.mxu1 %v1293_v0 }
  0xaa   : > { %919 = vmatpush3.bf16.msra.mxu0 %v1055_v7  ;;  %939 = vmatpush3.bf16.msra.mxu1 %v1063_v12 }
  0xab   : > { %920 = vmatprep.subr.bf16.mxu0 %v1293_v0  ;;  %940 = vmatprep.subr.bf16.mxu1 %v1293_v0 }
  0xae   : > { %921 = vmatpush3.bf16.msra.mxu0 %v1056_v9  ;;  %941 = vmatpush3.bf16.msra.mxu1 %v1064_v14 }
  0xaf   : > { %922 = vmatprep.subr.bf16.mxu0 %v1293_v0  ;;  %942 = vmatprep.subr.bf16.mxu1 %v1293_v0 }
  0xb2   : > { %923 = vmatpush3.bf16.msra.mxu0 %v1057_v11  ;;  %943 = vmatpush3.bf16.msra.mxu1 %v1065_v16 }
  0xb3   : > { %924 = vmatprep.subr.bf16.mxu0 %v1293_v0  ;;  %944 = vmatprep.subr.bf16.mxu1 %v1293_v0 }
  0xb6   : > { %925 = vmatpush3.bf16.msra.mxu0 %v1058_v13  ;;  %945 = vmatpush3.bf16.msra.mxu1 %v1066_v17 }
  0xb7   : > { %950 = vmatprep.subr.bf16.mxu0 %v1293_v0 }
  0xb9   : > { %927 = vmatmul.mubr.bf16.vlgmr.msra.gmra.mrb[0].mxu0 %v348_v15 }
  0xba   : > { %966 = vmatprep.mubr.msk.bf16.mxu0 %vm1294_vm0, %v1293_v0  ;;  %951 = vmatpush3.bf16.msra.mxu0 %v1067_v18 }
  0xbb   : > { %952 = vmatprep.subr.bf16.mxu0 %v1293_v0 }
  0xbe   : > { %953 = vmatpush3.bf16.msra.mxu0 %v1068_v19 }
  0xbf   : > { %954 = vmatprep.subr.bf16.mxu0 %v1293_v0 }
  0xc2   : > { %955 = vmatpush3.bf16.msra.mxu0 %v1069_v20 }
  0xc3   : > { %956 = vmatprep.subr.bf16.mxu0 %v1293_v0 }
  0xc6   : > { %957 = vmatpush3.bf16.msra.mxu0 %v1070_v21 }
  0xc7   : > { %958 = vmatprep.subr.bf16.mxu0 %v1293_v0 }
  0xca   : > { %959 = vmatpush3.bf16.msra.mxu0 %v1071_v22 }
  0xcb   : > { %960 = vmatprep.subr.bf16.mxu0 %v1293_v0 }
  0xce   : > { %961 = vmatpush3.bf16.msra.mxu0 %v1072_v23 }
  0xcf   : > { %962 = vmatprep.subr.bf16.mxu0 %v1293_v0 }
  0xd2   : > { %963 = vmatpush3.bf16.msra.mxu0 %v1073_v24 }
  0xd3   : > { %964 = vmatprep.subr.bf16.mxu0 %v1293_v0 }
  0xd6   : > { %965 = vmatpush3.bf16.msra.mxu0 %v1074_v32 }
 0x18c   : > { %v447_v25 = vpop.f32.mrb[0].mxu0 }
 0x18d   : > { %vm453_vm1 = vcmp.gt.f32.partialorder %v447_v25, 0.0  ;;  %v454_v26 = vmul.f32 0.01, %v447_v25  ;;  %v928_v27 = vpop.f32.mrb[1].mxu0 }
 0x18e   : > { %v450_v28 = vpop.f32.mrb[2].mxu0 }
 0x18f   : > { %v455_v29 = vsel %vm453_vm1, %v447_v25, %v454_v26  ;;  %v929_v30 = vpop.f32.mrb[3].mxu0 }
 0x190   : > { %v456_v31 = vpack.c.bf16 %v455_v29, %v455_v29 }
 0x192   : > { %947 = vmatmul.mubr.bf16.vlgmr.msra.gmra.mrb[0].mxu1 %v456_v31 }
 0x265   : > { %v555_v33 = vpop.f32.mrb[0].mxu1 }
 0x266   : > { %vm561_vm2 = vcmp.gt.f32.partialorder %v555_v33, 0.0  ;;  %v562_v34 = vmul.f32 0.01, %v555_v33  ;;  %v948_v35 = vpop.f32.mrb[1].mxu1 }
 0x267   : > { %v558_v36 = vpop.f32.mrb[2].mxu1 }
 0x268   : > { %v563_v37 = vsel %vm561_vm2, %v555_v33, %v562_v34  ;;  %v949_v38 = vpop.f32.mrb[3].mxu1 }
 0x269   : > { %v564_v39 = vpack.c.bf16 %v563_v37, %v563_v37 }
 0x26b   : > { %967 = vmatmul.mubr.bf16.vlgmr.msra.gmra.mrb[4].mxu0 %v564_v39 }
 0x33e   : > { %v663_v40 = vpop.f32.mrb[4].mxu0 }
 0x33f   : > { %669 = vst [vmem:[%s346_s27] sm:$0xff] %v663_v40  ;;  %v968_v41 = vpop.f32.mrb[5].mxu0 }
 0x340   : > { %v666_v42 = vpop.f32.mrb[6].mxu0 }
 0x341   : > { %1208 = shalt.err (!%p1205_p4)
}
 0x342   : > { %s1209_s25 = scalar_lea.hbm %s1645_s11, 128  ;;  %s1213_s8 = scalar_lea.hbm %s1695_s4, 512 }
 0x343   : > { %p1210_p0 = scmp.ne.s32.totalorder %s1645_s11, %s1209_s25  ;;  %p1214_p3 = scmp.lt.u32.totalorder %s1645_s11, %s1695_s4 }
 0x344   : > { %p1215_p1 = scmp.lt.u32.totalorder %s1213_s8, %s1209_s25  ;;  %p1217_p13 = scmp.lt.u32.totalorder %s1209_s25, %s1645_s11 }
 0x345   : > { %p1211_p5 = pnand %p1210_p0, %p1724_p6 }
 0x346   : > { %p1216_p8 = por %p1215_p1, %p1214_p3 }
 0x347   : > { %p1212_p9 = pneg %p1211_p5 }
 0x348   : > { %p1218_p10 = por %p1217_p13, %p1216_p8 }
 0x34a   : > { %p1219_p12 = pnand %p1218_p10, %p1212_p9 }
 0x34c   : > { %1222 = shalt.err (!%p1219_p12)
}
 0x34d   : > { %978 = dma.vmem_to_hbm [thread:$0]  (%p1724_p6), %s1640_s22, 128, %s1645_s11, %s671_s7   ;;  %v969_v43 = vpop.f32.mrb[7].mxu0 }
 0x34e PF: > { %s1725_s19 = sld [smem:[#allocation19_spill]]  ;;  %p998_p7 = scmp.ge.s32.totalorder %s1285_s20, 2 }
 0x34f   : > { %s697_s10 = sand.u32 1, %s1265_s15  }
 0x350   : > { %s698_s29 = scalar_lea.sflag [#allocation4], %s697_s10 }
 0x354   : > { %p1726_p11 = scmp.ne.s32.totalorder %s1725_s19, 0 }
 0x356   : > { %p994_p2 = pnand %p998_p7, %p1726_p11 }
 0x358   : > { %1260 = dma.done.wait (!%p994_p2), %s698_s29, 128  }
 0x359   : > { %1262 = vsyncadd (!%p994_p2), %s698_s29, 4294967168  ;;  %s26_s20 = sadd.s32 1, %s1285_s20   ;;  %s1727_s28 = sld [smem:[#allocation15_spill]] }
 0x35a   : > { %p23_p4 = scmp.ge.s32.totalorder %s26_s20, 6   ;;  %s1728_s17 = sld [smem:[#allocation18_spill]] }
 0x35b   : > { %s1729_s18 = sld [smem:[#allocation16_spill]]  ;;  %s1730_s19 = sld [smem:[#allocation17_spill]] }
 0x35c   : > { %s1731_s15 = smov %s1269_s16  ;;  %25 = sbr.rel (!%p23_p4) target bundleno = 12 (0xc), region = 118 }
 0x35f   : > { %s1732_s16 = smov %s1727_s28 }
 0x363   :  { %703 = vsyncpa [#allocation3], 1 }
 0x364   :  { %705 = vsyncpa [#allocation3 + $0x1], 1 }
 0x365   :  { %706 = vsyncpa [#allocation6], 1 }
 0x366   :  { %708 = vsyncpa [#allocation6 + $0x1], 1 }
 0x367   :  { %709 = vsyncpa [#allocation9], 1 }
 0x368   :  { %711 = vsyncpa [#allocation9 + $0x1], 1 }
 0x369   :  { %712 = vsyncpa [#allocation4], 1 }
 0x36a   :  { %714 = vsyncpa [#allocation4 + $0x1], 1 }

</bundles_post_ra>
